<compile_context>
chip_gen: v7x
topology: tpu7x:2x2x1
jax: 0.10.0
libtpu: 0.0.40
codegen_flags: <defaults>
</compile_context>

<pallas_src>
import functools

import jax
import jax.numpy as jnp
from jax.experimental import pallas as pl
from jax.experimental.pallas import tpu as pltpu


def _round_up(n, m):
    return ((n + m - 1) // m) * m


def _lstm_kernel(x2d_ref, wih_ref, whh_ref, b_ref, wfc_ref, bfc_ref,
                 out_ref, *, seq_len, batch_pad, hidden_dim):
    T, Bp, H = seq_len, batch_pad, hidden_dim

    # ---- Phase 1: input projection + bias for every timestep, one MXU pass --
    # gx[t*Bp:(t+1)*Bp, :] = x_t @ W_ih^T + (b_ih + b_hh)
    gx = (jnp.dot(x2d_ref[...], wih_ref[...],
                  preferred_element_type=jnp.float32)
          + b_ref[...])                                   # (T*Bp, 4H) value

    # Loop-invariant recurrent weights: loaded once, resident for the whole
    # recurrence, so only h_prev @ W_hh^T stays on the serial critical path.
    whh = whh_ref[...]                                    # (H, 4H)

    # ---- Phase 2: serial recurrence, fully unrolled (T is small & static) ---
    h = jnp.zeros((Bp, H), jnp.float32)
    c = jnp.zeros((Bp, H), jnp.float32)
    for t in range(T):
        gates = (gx[t * Bp:(t + 1) * Bp, :]
                 + jnp.dot(h, whh, preferred_element_type=jnp.float32))

        # Fused full-width activations: ONE sigmoid pass + ONE tanh pass over
        # the whole (Bp, 4H) = (8, 128) tile, then pick the gates out of the
        # activated tiles (PyTorch gate order: i, f, g, o).
        sig = jax.nn.sigmoid(gates)
        th = jnp.tanh(gates)
        i_g = sig[:, 0 * H:1 * H]
        f_g = sig[:, 1 * H:2 * H]
        g_g = th[:, 2 * H:3 * H]
        o_g = sig[:, 3 * H:4 * H]

        c = f_g * c + i_g * g_g
        h = o_g * jnp.tanh(c)

    # ---- Phase 3: FC head on h_T; lane-dense (padded-to-128) store ----------
    out = (jnp.dot(h, wfc_ref[...], preferred_element_type=jnp.float32)
           + bfc_ref[...])
    out_ref[...] = out.astype(out_ref.dtype)


def lstm_model_forward(x, params):
    """x: (B, T, F) float32 (PyTorch batch_first). Returns (B, output_size)."""
    B, T, F = x.shape
    w_ih, w_hh, b_ih, b_hh, w_fc, b_fc = (
        params["w_ih"], params["w_hh"], params["b_ih"], params["b_hh"],
        params["w_fc"], params["b_fc"])
    H = w_hh.shape[1]
    O = w_fc.shape[0]

    Bp = _round_up(max(B, 8), 8)        # sublane-friendly batch
    OP = _round_up(max(O, 128), 128)    # lane-dense FC output

    # (B,T,F) -> pad batch -> (T, Bp, F) -> flatten time into rows: (T*Bp, F).
    # Negligible at this size; at large B*T*F do Phase 1 in row order instead.
    x_p = jnp.pad(x, ((0, Bp - B), (0, 0), (0, 0)))
    x2d = jnp.transpose(x_p, (1, 0, 2)).reshape(T * Bp, F)

    wih_t = jnp.transpose(w_ih)                          # (F, 4H)
    whh_t = jnp.transpose(w_hh)                          # (H, 4H)
    bias = (b_ih + b_hh).reshape(1, 4 * H)               # (1, 4H)
    wfc_t = jnp.zeros((H, OP), jnp.float32).at[:, :O].set(jnp.transpose(w_fc))
    bfc = jnp.zeros((1, OP), jnp.float32).at[:, :O].set(b_fc.reshape(1, O))

    kernel = functools.partial(_lstm_kernel, seq_len=T, batch_pad=Bp,
                               hidden_dim=H)

    out_padded = pl.pallas_call(
        kernel,
        out_shape=jax.ShapeDtypeStruct((Bp, OP), jnp.float32),
        grid=(1,),
        in_specs=[
            pl.BlockSpec((T * Bp, F), lambda i: (0, 0)),     # x (all timesteps)
            pl.BlockSpec((F, 4 * H), lambda i: (0, 0)),      # W_ih^T
            pl.BlockSpec((H, 4 * H), lambda i: (0, 0)),      # W_hh^T
            pl.BlockSpec((1, 4 * H), lambda i: (0, 0)),      # b_ih + b_hh
            pl.BlockSpec((H, OP), lambda i: (0, 0)),         # W_fc^T (padded)
            pl.BlockSpec((1, OP), lambda i: (0, 0)),         # b_fc   (padded)
        ],
        out_specs=pl.BlockSpec((Bp, OP), lambda i: (0, 0)),
        compiler_params=pltpu.CompilerParams(
            dimension_semantics=("arbitrary",),
        ),
    )(x2d, wih_t, whh_t, bias, wfc_t, bfc)

    return out_padded[:B, :O]


def lstm_model_reference(x, params):
    """Pure-JAX reference of the same forward pass (for correctness check)."""
    w_ih, w_hh = params["w_ih"], params["w_hh"]
    b = params["b_ih"] + params["b_hh"]
    w_fc, b_fc = params["w_fc"], params["b_fc"]
    H = w_hh.shape[1]
    B = x.shape[0]

    def step(carry, x_t):
        h, c = carry
        gates = x_t @ w_ih.T + h @ w_hh.T + b
        i = jax.nn.sigmoid(gates[:, 0 * H:1 * H])
        f = jax.nn.sigmoid(gates[:, 1 * H:2 * H])
        g = jnp.tanh(gates[:, 2 * H:3 * H])
        o = jax.nn.sigmoid(gates[:, 3 * H:4 * H])
        c = f * c + i * g
        h = o * jnp.tanh(c)
        return (h, c), None

    h0 = jnp.zeros((B, H), jnp.float32)
    c0 = jnp.zeros((B, H), jnp.float32)
    (hT, _), _ = jax.lax.scan(step, (h0, c0), jnp.transpose(x, (1, 0, 2)))
    return hT @ w_fc.T + b_fc


def init_params(key, num_features, hidden_dim, output_size):
    """Deterministic init matching PyTorch shapes: U(-1/sqrt(H), 1/sqrt(H))."""
    ks = jax.random.split(key, 6)
    bound = 1.0 / jnp.sqrt(jnp.float32(hidden_dim))
    u = lambda k, shape: jax.random.uniform(k, shape, jnp.float32, -bound, bound)
    return {
        "w_ih": u(ks[0], (4 * hidden_dim, num_features)),
        "w_hh": u(ks[1], (4 * hidden_dim, hidden_dim)),
        "b_ih": u(ks[2], (4 * hidden_dim,)),
        "b_hh": u(ks[3], (4 * hidden_dim,)),
        "w_fc": u(ks[4], (output_size, hidden_dim)),
        "b_fc": u(ks[5], (output_size,)),
    }


if __name__ == "__main__":
    # Small shapes consistent with the module: batch=2, seq=8, features=4,
    # hidden=32 (4H = 128 lanes), output_size=1. num_layers=1 -> dropout no-op.
    B, T, F, H, O = 2, 8, 4, 32, 1

    key = jax.random.PRNGKey(0)
    k_x, k_p = jax.random.split(key)
    x = jax.random.normal(k_x, (B, T, F), jnp.float32)
    params = init_params(k_p, F, H, O)

    out = lstm_model_forward(x, params)
    out = jax.block_until_ready(out)

    ref = lstm_model_reference(x, params)
    assert out.shape == (B, O)
    assert jnp.allclose(out, ref, atol=1e-5, rtol=1e-5), (out, ref)

    print("KERNEL_OK")
</pallas_src>

<mosaic_0001>
module attributes {stable_mosaic.version = 11 : i64} {
  func.func @_lstm_kernel(%arg0: i32, %arg1: memref<64x4xf32, #tpu.memory_space<vmem>>, %arg2: memref<4x128xf32, #tpu.memory_space<vmem>>, %arg3: memref<32x128xf32, #tpu.memory_space<vmem>>, %arg4: memref<1x128xf32, #tpu.memory_space<vmem>>, %arg5: memref<32x128xf32, #tpu.memory_space<vmem>>, %arg6: memref<1x128xf32, #tpu.memory_space<vmem>>, %arg7: memref<8x128xf32, #tpu.memory_space<vmem>>) attributes {dimension_semantics = [#tpu.dimension_semantics<arbitrary>], iteration_bounds = array<i64: 1>, scalar_prefetch = 0 : i64, scratch_operands = 0 : i64, tpu.core_type = #tpu.core_type<tc>, window_params = [{pipeline_mode = #tpu.pipeline_mode<synchronous>, transform_indices = @transform_0, window_bounds = array<i64: 64, 4>}, {pipeline_mode = #tpu.pipeline_mode<synchronous>, transform_indices = @transform_1, window_bounds = array<i64: 4, 128>}, {pipeline_mode = #tpu.pipeline_mode<synchronous>, transform_indices = @transform_2, window_bounds = array<i64: 32, 128>}, {pipeline_mode = #tpu.pipeline_mode<synchronous>, transform_indices = @transform_3, window_bounds = array<i64: 1, 128>}, {pipeline_mode = #tpu.pipeline_mode<synchronous>, transform_indices = @transform_4, window_bounds = array<i64: 32, 128>}, {pipeline_mode = #tpu.pipeline_mode<synchronous>, transform_indices = @transform_5, window_bounds = array<i64: 1, 128>}, {pipeline_mode = #tpu.pipeline_mode<synchronous>, transform_indices = @transform_6, window_bounds = array<i64: 8, 128>}]} {
    %c0 = arith.constant 0 : index
    %c0_0 = arith.constant 0 : index
    %0 = vector.load %arg1[%c0, %c0_0] : memref<64x4xf32, #tpu.memory_space<vmem>>, vector<64x4xf32>
    %c0_1 = arith.constant 0 : index
    %c0_2 = arith.constant 0 : index
    %1 = vector.load %arg2[%c0_1, %c0_2] : memref<4x128xf32, #tpu.memory_space<vmem>>, vector<4x128xf32>
    %cst = arith.constant dense<0.000000e+00> : vector<64x128xf32>
    %2 = tpu.matmul %0, %1, %cst {dimension_numbers = #tpu.dot_dimension_numbers<[1], [0], [0], [1], [0, 0, 1, 1], [], []>} : vector<64x4xf32>, vector<4x128xf32>, vector<64x128xf32> -> vector<64x128xf32>
    %c0_3 = arith.constant 0 : index
    %c0_4 = arith.constant 0 : index
    %3 = vector.load %arg4[%c0_3, %c0_4] : memref<1x128xf32, #tpu.memory_space<vmem>>, vector<1x128xf32>
    %4 = vector.broadcast %3 : vector<1x128xf32> to vector<64x128xf32>
    %5 = arith.addf %2, %4 : vector<64x128xf32>
    %c0_5 = arith.constant 0 : index
    %c0_6 = arith.constant 0 : index
    %6 = vector.load %arg3[%c0_5, %c0_6] : memref<32x128xf32, #tpu.memory_space<vmem>>, vector<32x128xf32>
    %cst_7 = arith.constant 0.000000e+00 : f32
    %7 = vector.broadcast %cst_7 : f32 to vector<8x32xf32>
    %cst_8 = arith.constant 0.000000e+00 : f32
    %8 = vector.broadcast %cst_8 : f32 to vector<8x32xf32>
    %9 = vector.extract_strided_slice %5 {offsets = [0, 0], sizes = [8, 128], strides = [1, 1]} : vector<64x128xf32> to vector<8x128xf32>
    %cst_9 = arith.constant dense<0.000000e+00> : vector<8x128xf32>
    %10 = tpu.matmul %7, %6, %cst_9 {dimension_numbers = #tpu.dot_dimension_numbers<[1], [0], [0], [1], [0, 0, 1, 1], [], []>} : vector<8x32xf32>, vector<32x128xf32>, vector<8x128xf32> -> vector<8x128xf32>
    %11 = arith.addf %9, %10 : vector<8x128xf32>
    %12 = arith.negf %11 : vector<8x128xf32>
    %13 = math.exp %12 : vector<8x128xf32>
    %cst_10 = arith.constant 1.000000e+00 : f32
    %14 = vector.broadcast %cst_10 : f32 to vector<8x128xf32>
    %15 = arith.addf %14, %13 : vector<8x128xf32>
    %16 = arith.divf %14, %15 : vector<8x128xf32>
    %17 = math.tanh %11 : vector<8x128xf32>
    %18 = vector.extract_strided_slice %16 {offsets = [0, 0], sizes = [8, 32], strides = [1, 1]} : vector<8x128xf32> to vector<8x32xf32>
    %19 = vector.extract_strided_slice %16 {offsets = [0, 32], sizes = [8, 32], strides = [1, 1]} : vector<8x128xf32> to vector<8x32xf32>
    %20 = vector.extract_strided_slice %17 {offsets = [0, 64], sizes = [8, 32], strides = [1, 1]} : vector<8x128xf32> to vector<8x32xf32>
    %21 = vector.extract_strided_slice %16 {offsets = [0, 96], sizes = [8, 32], strides = [1, 1]} : vector<8x128xf32> to vector<8x32xf32>
    %22 = arith.mulf %19, %8 : vector<8x32xf32>
    %23 = arith.mulf %18, %20 : vector<8x32xf32>
    %24 = arith.addf %22, %23 : vector<8x32xf32>
    %25 = math.tanh %24 : vector<8x32xf32>
    %26 = arith.mulf %21, %25 : vector<8x32xf32>
    %27 = vector.extract_strided_slice %5 {offsets = [8, 0], sizes = [8, 128], strides = [1, 1]} : vector<64x128xf32> to vector<8x128xf32>
    %cst_11 = arith.constant dense<0.000000e+00> : vector<8x128xf32>
    %28 = tpu.matmul %26, %6, %cst_11 {dimension_numbers = #tpu.dot_dimension_numbers<[1], [0], [0], [1], [0, 0, 1, 1], [], []>} : vector<8x32xf32>, vector<32x128xf32>, vector<8x128xf32> -> vector<8x128xf32>
    %29 = arith.addf %27, %28 : vector<8x128xf32>
    %30 = arith.negf %29 : vector<8x128xf32>
    %31 = math.exp %30 : vector<8x128xf32>
    %cst_12 = arith.constant 1.000000e+00 : f32
    %32 = vector.broadcast %cst_12 : f32 to vector<8x128xf32>
    %33 = arith.addf %32, %31 : vector<8x128xf32>
    %34 = arith.divf %32, %33 : vector<8x128xf32>
    %35 = math.tanh %29 : vector<8x128xf32>
    %36 = vector.extract_strided_slice %34 {offsets = [0, 0], sizes = [8, 32], strides = [1, 1]} : vector<8x128xf32> to vector<8x32xf32>
    %37 = vector.extract_strided_slice %34 {offsets = [0, 32], sizes = [8, 32], strides = [1, 1]} : vector<8x128xf32> to vector<8x32xf32>
    %38 = vector.extract_strided_slice %35 {offsets = [0, 64], sizes = [8, 32], strides = [1, 1]} : vector<8x128xf32> to vector<8x32xf32>
    %39 = vector.extract_strided_slice %34 {offsets = [0, 96], sizes = [8, 32], strides = [1, 1]} : vector<8x128xf32> to vector<8x32xf32>
    %40 = arith.mulf %37, %24 : vector<8x32xf32>
    %41 = arith.mulf %36, %38 : vector<8x32xf32>
    %42 = arith.addf %40, %41 : vector<8x32xf32>
    %43 = math.tanh %42 : vector<8x32xf32>
    %44 = arith.mulf %39, %43 : vector<8x32xf32>
    %45 = vector.extract_strided_slice %5 {offsets = [16, 0], sizes = [8, 128], strides = [1, 1]} : vector<64x128xf32> to vector<8x128xf32>
    %cst_13 = arith.constant dense<0.000000e+00> : vector<8x128xf32>
    %46 = tpu.matmul %44, %6, %cst_13 {dimension_numbers = #tpu.dot_dimension_numbers<[1], [0], [0], [1], [0, 0, 1, 1], [], []>} : vector<8x32xf32>, vector<32x128xf32>, vector<8x128xf32> -> vector<8x128xf32>
    %47 = arith.addf %45, %46 : vector<8x128xf32>
    %48 = arith.negf %47 : vector<8x128xf32>
    %49 = math.exp %48 : vector<8x128xf32>
    %cst_14 = arith.constant 1.000000e+00 : f32
    %50 = vector.broadcast %cst_14 : f32 to vector<8x128xf32>
    %51 = arith.addf %50, %49 : vector<8x128xf32>
    %52 = arith.divf %50, %51 : vector<8x128xf32>
    %53 = math.tanh %47 : vector<8x128xf32>
    %54 = vector.extract_strided_slice %52 {offsets = [0, 0], sizes = [8, 32], strides = [1, 1]} : vector<8x128xf32> to vector<8x32xf32>
    %55 = vector.extract_strided_slice %52 {offsets = [0, 32], sizes = [8, 32], strides = [1, 1]} : vector<8x128xf32> to vector<8x32xf32>
    %56 = vector.extract_strided_slice %53 {offsets = [0, 64], sizes = [8, 32], strides = [1, 1]} : vector<8x128xf32> to vector<8x32xf32>
    %57 = vector.extract_strided_slice %52 {offsets = [0, 96], sizes = [8, 32], strides = [1, 1]} : vector<8x128xf32> to vector<8x32xf32>
    %58 = arith.mulf %55, %42 : vector<8x32xf32>
    %59 = arith.mulf %54, %56 : vector<8x32xf32>
    %60 = arith.addf %58, %59 : vector<8x32xf32>
    %61 = math.tanh %60 : vector<8x32xf32>
    %62 = arith.mulf %57, %61 : vector<8x32xf32>
    %63 = vector.extract_strided_slice %5 {offsets = [24, 0], sizes = [8, 128], strides = [1, 1]} : vector<64x128xf32> to vector<8x128xf32>
    %cst_15 = arith.constant dense<0.000000e+00> : vector<8x128xf32>
    %64 = tpu.matmul %62, %6, %cst_15 {dimension_numbers = #tpu.dot_dimension_numbers<[1], [0], [0], [1], [0, 0, 1, 1], [], []>} : vector<8x32xf32>, vector<32x128xf32>, vector<8x128xf32> -> vector<8x128xf32>
    %65 = arith.addf %63, %64 : vector<8x128xf32>
    %66 = arith.negf %65 : vector<8x128xf32>
    %67 = math.exp %66 : vector<8x128xf32>
    %cst_16 = arith.constant 1.000000e+00 : f32
    %68 = vector.broadcast %cst_16 : f32 to vector<8x128xf32>
    %69 = arith.addf %68, %67 : vector<8x128xf32>
    %70 = arith.divf %68, %69 : vector<8x128xf32>
    %71 = math.tanh %65 : vector<8x128xf32>
    %72 = vector.extract_strided_slice %70 {offsets = [0, 0], sizes = [8, 32], strides = [1, 1]} : vector<8x128xf32> to vector<8x32xf32>
    %73 = vector.extract_strided_slice %70 {offsets = [0, 32], sizes = [8, 32], strides = [1, 1]} : vector<8x128xf32> to vector<8x32xf32>
    %74 = vector.extract_strided_slice %71 {offsets = [0, 64], sizes = [8, 32], strides = [1, 1]} : vector<8x128xf32> to vector<8x32xf32>
    %75 = vector.extract_strided_slice %70 {offsets = [0, 96], sizes = [8, 32], strides = [1, 1]} : vector<8x128xf32> to vector<8x32xf32>
    %76 = arith.mulf %73, %60 : vector<8x32xf32>
    %77 = arith.mulf %72, %74 : vector<8x32xf32>
    %78 = arith.addf %76, %77 : vector<8x32xf32>
    %79 = math.tanh %78 : vector<8x32xf32>
    %80 = arith.mulf %75, %79 : vector<8x32xf32>
    %81 = vector.extract_strided_slice %5 {offsets = [32, 0], sizes = [8, 128], strides = [1, 1]} : vector<64x128xf32> to vector<8x128xf32>
    %cst_17 = arith.constant dense<0.000000e+00> : vector<8x128xf32>
    %82 = tpu.matmul %80, %6, %cst_17 {dimension_numbers = #tpu.dot_dimension_numbers<[1], [0], [0], [1], [0, 0, 1, 1], [], []>} : vector<8x32xf32>, vector<32x128xf32>, vector<8x128xf32> -> vector<8x128xf32>
    %83 = arith.addf %81, %82 : vector<8x128xf32>
    %84 = arith.negf %83 : vector<8x128xf32>
    %85 = math.exp %84 : vector<8x128xf32>
    %cst_18 = arith.constant 1.000000e+00 : f32
    %86 = vector.broadcast %cst_18 : f32 to vector<8x128xf32>
    %87 = arith.addf %86, %85 : vector<8x128xf32>
    %88 = arith.divf %86, %87 : vector<8x128xf32>
    %89 = math.tanh %83 : vector<8x128xf32>
    %90 = vector.extract_strided_slice %88 {offsets = [0, 0], sizes = [8, 32], strides = [1, 1]} : vector<8x128xf32> to vector<8x32xf32>
    %91 = vector.extract_strided_slice %88 {offsets = [0, 32], sizes = [8, 32], strides = [1, 1]} : vector<8x128xf32> to vector<8x32xf32>
    %92 = vector.extract_strided_slice %89 {offsets = [0, 64], sizes = [8, 32], strides = [1, 1]} : vector<8x128xf32> to vector<8x32xf32>
    %93 = vector.extract_strided_slice %88 {offsets = [0, 96], sizes = [8, 32], strides = [1, 1]} : vector<8x128xf32> to vector<8x32xf32>
    %94 = arith.mulf %91, %78 : vector<8x32xf32>
    %95 = arith.mulf %90, %92 : vector<8x32xf32>
    %96 = arith.addf %94, %95 : vector<8x32xf32>
    %97 = math.tanh %96 : vector<8x32xf32>
    %98 = arith.mulf %93, %97 : vector<8x32xf32>
    %99 = vector.extract_strided_slice %5 {offsets = [40, 0], sizes = [8, 128], strides = [1, 1]} : vector<64x128xf32> to vector<8x128xf32>
    %cst_19 = arith.constant dense<0.000000e+00> : vector<8x128xf32>
    %100 = tpu.matmul %98, %6, %cst_19 {dimension_numbers = #tpu.dot_dimension_numbers<[1], [0], [0], [1], [0, 0, 1, 1], [], []>} : vector<8x32xf32>, vector<32x128xf32>, vector<8x128xf32> -> vector<8x128xf32>
    %101 = arith.addf %99, %100 : vector<8x128xf32>
    %102 = arith.negf %101 : vector<8x128xf32>
    %103 = math.exp %102 : vector<8x128xf32>
    %cst_20 = arith.constant 1.000000e+00 : f32
    %104 = vector.broadcast %cst_20 : f32 to vector<8x128xf32>
    %105 = arith.addf %104, %103 : vector<8x128xf32>
    %106 = arith.divf %104, %105 : vector<8x128xf32>
    %107 = math.tanh %101 : vector<8x128xf32>
    %108 = vector.extract_strided_slice %106 {offsets = [0, 0], sizes = [8, 32], strides = [1, 1]} : vector<8x128xf32> to vector<8x32xf32>
    %109 = vector.extract_strided_slice %106 {offsets = [0, 32], sizes = [8, 32], strides = [1, 1]} : vector<8x128xf32> to vector<8x32xf32>
    %110 = vector.extract_strided_slice %107 {offsets = [0, 64], sizes = [8, 32], strides = [1, 1]} : vector<8x128xf32> to vector<8x32xf32>
    %111 = vector.extract_strided_slice %106 {offsets = [0, 96], sizes = [8, 32], strides = [1, 1]} : vector<8x128xf32> to vector<8x32xf32>
    %112 = arith.mulf %109, %96 : vector<8x32xf32>
    %113 = arith.mulf %108, %110 : vector<8x32xf32>
    %114 = arith.addf %112, %113 : vector<8x32xf32>
    %115 = math.tanh %114 : vector<8x32xf32>
    %116 = arith.mulf %111, %115 : vector<8x32xf32>
    %117 = vector.extract_strided_slice %5 {offsets = [48, 0], sizes = [8, 128], strides = [1, 1]} : vector<64x128xf32> to vector<8x128xf32>
    %cst_21 = arith.constant dense<0.000000e+00> : vector<8x128xf32>
    %118 = tpu.matmul %116, %6, %cst_21 {dimension_numbers = #tpu.dot_dimension_numbers<[1], [0], [0], [1], [0, 0, 1, 1], [], []>} : vector<8x32xf32>, vector<32x128xf32>, vector<8x128xf32> -> vector<8x128xf32>
    %119 = arith.addf %117, %118 : vector<8x128xf32>
    %120 = arith.negf %119 : vector<8x128xf32>
    %121 = math.exp %120 : vector<8x128xf32>
    %cst_22 = arith.constant 1.000000e+00 : f32
    %122 = vector.broadcast %cst_22 : f32 to vector<8x128xf32>
    %123 = arith.addf %122, %121 : vector<8x128xf32>
    %124 = arith.divf %122, %123 : vector<8x128xf32>
    %125 = math.tanh %119 : vector<8x128xf32>
    %126 = vector.extract_strided_slice %124 {offsets = [0, 0], sizes = [8, 32], strides = [1, 1]} : vector<8x128xf32> to vector<8x32xf32>
    %127 = vector.extract_strided_slice %124 {offsets = [0, 32], sizes = [8, 32], strides = [1, 1]} : vector<8x128xf32> to vector<8x32xf32>
    %128 = vector.extract_strided_slice %125 {offsets = [0, 64], sizes = [8, 32], strides = [1, 1]} : vector<8x128xf32> to vector<8x32xf32>
    %129 = vector.extract_strided_slice %124 {offsets = [0, 96], sizes = [8, 32], strides = [1, 1]} : vector<8x128xf32> to vector<8x32xf32>
    %130 = arith.mulf %127, %114 : vector<8x32xf32>
    %131 = arith.mulf %126, %128 : vector<8x32xf32>
    %132 = arith.addf %130, %131 : vector<8x32xf32>
    %133 = math.tanh %132 : vector<8x32xf32>
    %134 = arith.mulf %129, %133 : vector<8x32xf32>
    %135 = vector.extract_strided_slice %5 {offsets = [56, 0], sizes = [8, 128], strides = [1, 1]} : vector<64x128xf32> to vector<8x128xf32>
    %cst_23 = arith.constant dense<0.000000e+00> : vector<8x128xf32>
    %136 = tpu.matmul %134, %6, %cst_23 {dimension_numbers = #tpu.dot_dimension_numbers<[1], [0], [0], [1], [0, 0, 1, 1], [], []>} : vector<8x32xf32>, vector<32x128xf32>, vector<8x128xf32> -> vector<8x128xf32>
    %137 = arith.addf %135, %136 : vector<8x128xf32>
    %138 = arith.negf %137 : vector<8x128xf32>
    %139 = math.exp %138 : vector<8x128xf32>
    %cst_24 = arith.constant 1.000000e+00 : f32
    %140 = vector.broadcast %cst_24 : f32 to vector<8x128xf32>
    %141 = arith.addf %140, %139 : vector<8x128xf32>
    %142 = arith.divf %140, %141 : vector<8x128xf32>
    %143 = math.tanh %137 : vector<8x128xf32>
    %144 = vector.extract_strided_slice %142 {offsets = [0, 0], sizes = [8, 32], strides = [1, 1]} : vector<8x128xf32> to vector<8x32xf32>
    %145 = vector.extract_strided_slice %142 {offsets = [0, 32], sizes = [8, 32], strides = [1, 1]} : vector<8x128xf32> to vector<8x32xf32>
    %146 = vector.extract_strided_slice %143 {offsets = [0, 64], sizes = [8, 32], strides = [1, 1]} : vector<8x128xf32> to vector<8x32xf32>
    %147 = vector.extract_strided_slice %142 {offsets = [0, 96], sizes = [8, 32], strides = [1, 1]} : vector<8x128xf32> to vector<8x32xf32>
    %148 = arith.mulf %145, %132 : vector<8x32xf32>
    %149 = arith.mulf %144, %146 : vector<8x32xf32>
    %150 = arith.addf %148, %149 : vector<8x32xf32>
    %151 = math.tanh %150 : vector<8x32xf32>
    %152 = arith.mulf %147, %151 : vector<8x32xf32>
    %c0_25 = arith.constant 0 : index
    %c0_26 = arith.constant 0 : index
    %153 = vector.load %arg5[%c0_25, %c0_26] : memref<32x128xf32, #tpu.memory_space<vmem>>, vector<32x128xf32>
    %cst_27 = arith.constant dense<0.000000e+00> : vector<8x128xf32>
    %154 = tpu.matmul %152, %153, %cst_27 {dimension_numbers = #tpu.dot_dimension_numbers<[1], [0], [0], [1], [0, 0, 1, 1], [], []>} : vector<8x32xf32>, vector<32x128xf32>, vector<8x128xf32> -> vector<8x128xf32>
    %c0_28 = arith.constant 0 : index
    %c0_29 = arith.constant 0 : index
    %155 = vector.load %arg6[%c0_28, %c0_29] : memref<1x128xf32, #tpu.memory_space<vmem>>, vector<1x128xf32>
    %156 = vector.broadcast %155 : vector<1x128xf32> to vector<8x128xf32>
    %157 = arith.addf %154, %156 : vector<8x128xf32>
    %c0_30 = arith.constant 0 : index
    %c0_31 = arith.constant 0 : index
    %158 = vector.load %arg7[%c0_30, %c0_31] : memref<8x128xf32, #tpu.memory_space<vmem>>, vector<8x128xf32>
    tpu.vector_store %arg7[%c0_30, %c0_31], %157 {strides = array<i32>} : memref<8x128xf32, #tpu.memory_space<vmem>>, vector<8x128xf32>,
    return
  }
  func.func @transform_0(%arg0: i32) -> (i32, i32) {
    %c0_i32 = arith.constant 0 : i32
    %c0_i32_0 = arith.constant 0 : i32
    %c0_i32_1 = arith.constant 0 : i32
    return %c0_i32, %c0_i32_0 : i32, i32
  }
  func.func @transform_1(%arg0: i32) -> (i32, i32) {
    %c0_i32 = arith.constant 0 : i32
    %c0_i32_0 = arith.constant 0 : i32
    %c0_i32_1 = arith.constant 0 : i32
    return %c0_i32, %c0_i32_0 : i32, i32
  }
  func.func @transform_2(%arg0: i32) -> (i32, i32) {
    %c0_i32 = arith.constant 0 : i32
    %c0_i32_0 = arith.constant 0 : i32
    %c0_i32_1 = arith.constant 0 : i32
    return %c0_i32, %c0_i32_0 : i32, i32
  }
  func.func @transform_3(%arg0: i32) -> (i32, i32) {
    %c0_i32 = arith.constant 0 : i32
    %c0_i32_0 = arith.constant 0 : i32
    %c0_i32_1 = arith.constant 0 : i32
    return %c0_i32, %c0_i32_0 : i32, i32
  }
  func.func @transform_4(%arg0: i32) -> (i32, i32) {
    %c0_i32 = arith.constant 0 : i32
    %c0_i32_0 = arith.constant 0 : i32
    %c0_i32_1 = arith.constant 0 : i32
    return %c0_i32, %c0_i32_0 : i32, i32
  }
  func.func @transform_5(%arg0: i32) -> (i32, i32) {
    %c0_i32 = arith.constant 0 : i32
    %c0_i32_0 = arith.constant 0 : i32
    %c0_i32_1 = arith.constant 0 : i32
    return %c0_i32, %c0_i32_0 : i32, i32
  }
  func.func @transform_6(%arg0: i32) -> (i32, i32) {
    %c0_i32 = arith.constant 0 : i32
    %c0_i32_0 = arith.constant 0 : i32
    %c0_i32_1 = arith.constant 0 : i32
    return %c0_i32, %c0_i32_0 : i32, i32
  }
}

</mosaic_0001>

<bundles_post_ra>
// kernel: tpu_custom_call.1
= control target key start
LH: loop header
LB: loop body
LE: loop exit
PB: predicated region body
PF: predicated region fallthrough
CT: control target
= control target key end

     0   :  { %vm65_vm0 = vcmask 1043456   ;;  %v1420_v3 = vmov 0.0|0.0   ;;  %vm40_vm1 = vcmask 31744   ;;  %s1657_s0 = inlined_call_operand.vmem [shape: f32[64,4], index: 0, kind: input, shape index: {}]   ;;  %s1658_s1 = inlined_call_operand.vmem [shape: f32[4,128], index: 1, kind: input, shape index: {}]   ;;  %s1659_s2 = inlined_call_operand.vmem [shape: f32[32,128], index: 2, kind: input, shape index: {}]   ;;  %s1660_s3 = inlined_call_operand.vmem [shape: f32[1,128], index: 3, kind: input, shape index: {}]   ;;  %s1661_s4 = inlined_call_operand.vmem [shape: f32[32,128], index: 4, kind: input, shape index: {}]   ;;  %s1662_s5 = inlined_call_operand.vmem [shape: f32[1,128], index: 5, kind: input, shape index: {}]   ;;  %s1663_s6 = inlined_call_operand.hbm [shape: f32[8,128], index: 6, kind: output, shape index: {}]  }
   0x1   :  { %v174_v0 = vld [vmem:[%s1659_s2] sm:$0xff]  ;;  %v175_v1 = vld [vmem:[%s1659_s2 + $0x8] sm:$0xff]  ;;  %1272 = vmatprep.subr.bf16.mxu1 %v1420_v3  ;;  %v176_v7 = vld [vmem:[%s1659_s2 + $0x10] sm:$0xff] }
   0x2   :  { %v32_v2 = vld [vmem:[%s1658_s1] sm:$0xf]  ;;  %v1471_v4 = vpack.c.bf16 %v175_v1, %v174_v0  ;;  %v25_v6 = vld [vmem:[%s1657_s0 + $0x8] sm:$0xff]  ;;  %v177_v8 = vld [vmem:[%s1659_s2 + $0x18] sm:$0xff] }
   0x3   :  { %1159 = vmatprep.subr.msk.mxu0 %vm65_vm0, %v32_v2  ;;  %v24_v5 = vld [vmem:[%s1657_s0] sm:$0xff] }
   0x4   :  { %1160 = vmatpush3.msk.msra.mxu0 %vm65_vm0, %v32_v2  ;;  %1161 = vmatprep.mubr.msk.f32.mxu0 %vm40_vm1, %v24_v5 }
   0x5   :  { %11 = vsyncpa [#allocation3], 0  ;;  %1274 = vmatpush3.bf16.msra.mxu1 %v1471_v4  ;;  %1162 = vmatmul.mubr.msk.f32.vlgmr.msra.gmra.mrb[0].mxu0 %vm40_vm1, %v25_v6  ;;  %v1488_v9 = vpack.c.bf16 %v177_v8, %v176_v7  ;;  %vm1421_vm2 = vmmov 0   ;;  %v1422_v10 = vmov 0.0   ;;  %v1510_v12 = vld [vmem:[%s1660_s3] ss:$0 sm:$0xff] }
   0x6   :  { %1275 = vmatprep.subr.bf16.mxu1 %v1420_v3  ;;  %1181 = vmatprep.mubr.msk.f32.mxu1 %vm1421_vm2, %v1422_v10  ;;  %s1423_s11 = smov 64   ;;  %s1424_s3 = smov 32   ;;  %vm178_vm3 = vcmask 261120   ;;  %v26_v46 = vld [vmem:[%s1657_s0 + $0x10] sm:$0xff]  ;;  %v27_v47 = vld [vmem:[%s1657_s0 + $0x18] sm:$0xff]  ;;  %v28_v48 = vld [vmem:[%s1657_s0 + $0x20] sm:$0xff] }
   0x7   :  { %1284 = vmatprep.subr.bf16.mxu0 %v1420_v3  ;;  %1164 = vmatprep.mubr.msk.f32.mxu0 %vm40_vm1, %v26_v46  ;;  %v29_v49 = vld [vmem:[%s1657_s0 + $0x28] sm:$0xff]  ;;  %v30_v50 = vld [vmem:[%s1657_s0 + $0x30] sm:$0xff]  ;;  %v31_v51 = vld [vmem:[%s1657_s0 + $0x38] sm:$0xff] }
   0x8   :  { %1286 = vmatpush3.bf16.msra.mxu0 %v1471_v4 }
   0x9   :  { %1277 = vmatpush3.bf16.msra.mxu1 %v1488_v9  ;;  %1287 = vmatprep.subr.bf16.mxu0 %v1420_v3 }
   0xa   :  { %1278 = vmatprep.subr.bf16.mxu1 %v1420_v3  ;;  %1165 = vmatmul.mubr.msk.f32.gmra.mrb[2].mxu0 %vm40_vm1, %v27_v47 }
   0xb   :  { %1167 = vmatprep.mubr.msk.f32.mxu0 %vm40_vm1, %v28_v48 }
   0xc   :  { %1182 = vmatmul.mubr.f32.vlgmr.msra.gmra.mrb[0].mxu1 %v1422_v10  ;;  %1289 = vmatpush3.bf16.msra.mxu0 %v1488_v9 }
   0xd   :  { %1280 = vmatpush3.bf16.msra.mxu1 %v1471_v4  ;;  %1192 = vmatprep.mubr.msk.f32.mxu1 %vm1421_vm2, %v1422_v10 }
   0xe   :  { %1281 = vmatprep.subr.bf16.mxu1 %v1420_v3  ;;  %1296 = vmatprep.subr.bf16.mxu0 %v1420_v3 }
   0xf   :  { %1168 = vmatmul.mubr.msk.f32.gmra.mrb[4].mxu0 %vm40_vm1, %v29_v49 }
  0x10   :  { %1170 = vmatprep.mubr.msk.f32.mxu0 %vm40_vm1, %v30_v50 }
  0x11   :  { %1283 = vmatpush3.bf16.msra.mxu1 %v1488_v9 }
  0x12   :  { %1290 = vmatprep.subr.bf16.mxu1 %v1420_v3 }
  0x13   :  { %1171 = vmatmul.mubr.msk.f32.gmra.mrb[6].mxu0 %vm40_vm1, %v31_v51 }
  0x14   :  { %1203 = vmatprep.mubr.msk.f32.mxu0 %vm1421_vm2, %v1422_v10 }
  0xd8   :  { %v1163_v11 = vpop.f32.mrb[0].mxu0 }
  0xd9   :  { %v135_v13 = vpop.f32.mrb[1].mxu0  ;;  %v141_v32 = vadd.f32 %v1163_v11, %v1510_v12 }
  0xda   :  { %v136_v14 = vadd.f32 %v1510_v12, %v135_v13 }
  0xdd   :  { %v1166_v55 = vpop.f32.mrb[2].mxu0 }
  0xde   :  { %v145_v56 = vpop.f32.mrb[3].mxu0 }
  0xdf   :  { %v248_v15 = vpop.f32.mrb[0].mxu1  ;;  %v146_v62 = vadd.f32 %v1510_v12, %v145_v56 }
  0xe0   :  { %v252_v16 = vadd.f32 %v248_v15, %v136_v14  ;;  %v1183_v17 = vpop.f32.mrb[1].mxu1 }
  0xe2   :  { %1332 = vtanh.f32 %v252_v16  ;;  %v1088_v19 = vmul.f32 -1.442695, %v252_v16  ;;  %v1555_v57 = vpop.f32.mrb[4].mxu0 }
  0xe3   :  { %v1557_v58 = vpop.f32.mrb[5].mxu0 }
  0xe4   :  { %1334 = vpow2.f32 %v1088_v19 }
  0xe6   :  { %v1559_v59 = vpop.f32.mrb[6].mxu0 }
  0xe7   :  { %v1561_v60 = vpop.f32.mrb[7].mxu0 }
  0xec   :  { %v1333_v18 = vpop.eup %1332 }
  0xed   :  { %262 = vrot.lane.b32.xlu0 %v1333_v18, %s1423_s11 }
  0xee   :  { %v1335_v20 = vpop.eup %1334 }
  0xef   :  { %v256_v21 = vadd.f32 1.0, %v1335_v20 }
  0xf1   :  { %1336 = vrcp.f32 %v256_v21  ;;  %v151_v21 = vadd.f32 %v1166_v55, %v1510_v12 }
  0xfb   :  { %v1337_v22 = vpop.eup %1336 }
  0xfc   :  { %v260_v25 = vmul.f32 0.0, %v1337_v22 }
 0x15f   :  { %v263_v23 = vpop.permute.xlu0 %262 }
 0x160   :  { %v265_v24 = vmul.f32 %v1337_v22, %v263_v23 }
 0x162   :  { %267 = vrot.lane.b32.xlu0 %v265_v24, %s1424_s3 }
 0x1d4   :  { %v268_v26 = vpop.permute.xlu0 %267 }
 0x1d5   :  { %v270_v27 = vadd.f32 %v268_v26, %v260_v25 }
 0x1d7   :  { %1338 = vtanh.f32 %v270_v27 }
 0x1e1   :  { %v1339_v28 = vpop.eup %1338 }
 0x1e2   :  { %273 = vrot.lane.b32.xlu1 %v1339_v28, %s1423_s11 }
 0x254   :  { %v274_v29 = vpop.permute.xlu1 %273 }
 0x255   :  { %v276_v30 = vmul.f32 %v1337_v22, %v274_v29 }
 0x257   :  { %278 = vrot.lane.b32.xlu1 %v276_v30, %s1424_s3 }
 0x2c9   :  { %v279_v31 = vpop.permute.xlu1 %278 }
 0x2ca   :  { %1193 = vmatmul.mubr.msk.f32.vlgmr.msra.gmra.mrb[2].mxu1 %vm178_vm3, %v279_v31 }
 0x2cb   :  { %1292 = vmatpush3.bf16.msra.mxu1 %v1471_v4  ;;  %1214 = vmatprep.mubr.msk.f32.mxu1 %vm1421_vm2, %v1422_v10 }
 0x2cc   :  { %1293 = vmatprep.subr.bf16.mxu1 %v1420_v3 }
 0x2cf   :  { %1295 = vmatpush3.bf16.msra.mxu1 %v1488_v9 }
 0x2d0   :  { %1302 = vmatprep.subr.bf16.mxu1 %v1420_v3 }
 0x39d   :  { %v348_v33 = vpop.f32.mrb[2].mxu1 }
 0x39e   :  { %v352_v34 = vadd.f32 %v348_v33, %v141_v32  ;;  %v1194_v35 = vpop.f32.mrb[3].mxu1 }
 0x3a0   :  { %1340 = vtanh.f32 %v352_v34  ;;  %v1090_v37 = vmul.f32 -1.442695, %v352_v34 }
 0x3a2   :  { %1342 = vpow2.f32 %v1090_v37 }
 0x3aa   :  { %v1341_v36 = vpop.eup %1340 }
 0x3ab   :  { %362 = vrot.lane.b32.xlu0 %v1341_v36, %s1423_s11 }
 0x3ac   :  { %v1343_v38 = vpop.eup %1342 }
 0x3ad   :  { %v356_v39 = vadd.f32 1.0, %v1343_v38 }
 0x3af   :  { %1344 = vrcp.f32 %v356_v39  ;;  %v156_v39 = vadd.f32 %v1510_v12, %v1557_v58  ;;  %v161_v58 = vadd.f32 %v1555_v57, %v1510_v12 }
 0x3b9   :  { %v1345_v40 = vpop.eup %1344 }
 0x3ba   :  { %v360_v43 = vmul.f32 %v1345_v40, %v270_v27 }
 0x41d   :  { %v363_v41 = vpop.permute.xlu0 %362 }
 0x41e   :  { %v365_v42 = vmul.f32 %v1345_v40, %v363_v41 }
 0x420   :  { %367 = vrot.lane.b32.xlu1 %v365_v42, %s1424_s3 }
 0x492   :  { %v368_v44 = vpop.permute.xlu1 %367 }
 0x493   :  { %v370_v45 = vadd.f32 %v368_v44, %v360_v43 }
 0x495   :  { %1346 = vtanh.f32 %v370_v45 }
 0x49f   :  { %v1347_v52 = vpop.eup %1346 }
 0x4a0   :  { %373 = vrot.lane.b32.xlu0 %v1347_v52, %s1423_s11 }
 0x512   :  { %v374_v53 = vpop.permute.xlu0 %373 }
 0x513   :  { %v376_v54 = vmul.f32 %v1345_v40, %v374_v53 }
 0x515   :  { %378 = vrot.lane.b32.xlu1 %v376_v54, %s1424_s3 }
 0x587   :  { %v379_v61 = vpop.permute.xlu1 %378 }
 0x588   :  { %1204 = vmatmul.mubr.msk.f32.vlgmr.msra.gmra.mrb[8].mxu0 %vm178_vm3, %v379_v61 }
 0x589   :  { %1298 = vmatpush3.bf16.msra.mxu0 %v1471_v4  ;;  %1225 = vmatprep.mubr.msk.f32.mxu0 %vm1421_vm2, %v1422_v10 }
 0x58a   :  { %1299 = vmatprep.subr.bf16.mxu0 %v1420_v3 }
 0x58d   :  { %1301 = vmatpush3.bf16.msra.mxu0 %v1488_v9 }
 0x58e   :  { %1308 = vmatprep.subr.bf16.mxu0 %v1420_v3 }
 0x65b   :  { %v448_v63 = vpop.f32.mrb[8].mxu0 }
 0x65c   :  { %v452_v0 = vadd.f32 %v448_v63, %v146_v62  ;;  %v1205_v1 = vpop.f32.mrb[9].mxu0 }
 0x65e   :  { %1348 = vtanh.f32 %v452_v0  ;;  %v1092_v5 = vmul.f32 -1.442695, %v452_v0 }
 0x660   :  { %1350 = vpow2.f32 %v1092_v5 }
 0x668   :  { %v1349_v2 = vpop.eup %1348 }
 0x669   :  { %462 = vrot.lane.b32.xlu0 %v1349_v2, %s1423_s11 }
 0x66a   :  { %v1351_v6 = vpop.eup %1350 }
 0x66b   :  { %v456_v7 = vadd.f32 1.0, %v1351_v6 }
 0x66d   :  { %1352 = vrcp.f32 %v456_v7 }
 0x677   :  { %v1353_v8 = vpop.eup %1352 }
 0x678   :  { %v460_v14 = vmul.f32 %v1353_v8, %v370_v45 }
 0x6db   :  { %v463_v11 = vpop.permute.xlu0 %462 }
 0x6dc   :  { %v465_v13 = vmul.f32 %v1353_v8, %v463_v11 }
 0x6de   :  { %467 = vrot.lane.b32.xlu1 %v465_v13, %s1424_s3 }
 0x750   :  { %v468_v15 = vpop.permute.xlu1 %467 }
 0x751   :  { %v470_v16 = vadd.f32 %v468_v15, %v460_v14 }
 0x753   :  { %1354 = vtanh.f32 %v470_v16 }
 0x75d   :  { %v1355_v17 = vpop.eup %1354 }
 0x75e   :  { %473 = vrot.lane.b32.xlu0 %v1355_v17, %s1423_s11 }
 0x7d0   :  { %v474_v18 = vpop.permute.xlu0 %473 }
 0x7d1   :  { %v476_v19 = vmul.f32 %v1353_v8, %v474_v18 }
 0x7d3   :  { %478 = vrot.lane.b32.xlu1 %v476_v19, %s1424_s3 }
 0x845   :  { %v479_v20 = vpop.permute.xlu1 %478 }
 0x846   :  { %1215 = vmatmul.mubr.msk.f32.vlgmr.msra.gmra.mrb[4].mxu1 %vm178_vm3, %v479_v20 }
 0x847   :  { %1304 = vmatpush3.bf16.msra.mxu1 %v1471_v4  ;;  %1236 = vmatprep.mubr.msk.f32.mxu1 %vm1421_vm2, %v1422_v10 }
 0x848   :  { %1305 = vmatprep.subr.bf16.mxu1 %v1420_v3 }
 0x84b   :  { %1307 = vmatpush3.bf16.msra.mxu1 %v1488_v9 }
 0x84c   :  { %1314 = vmatprep.subr.bf16.mxu1 %v1420_v3 }
 0x919   :  { %v548_v22 = vpop.f32.mrb[4].mxu1 }
 0x91a   :  { %v552_v23 = vadd.f32 %v548_v22, %v151_v21  ;;  %v1216_v24 = vpop.f32.mrb[5].mxu1 }
 0x91c   :  { %1356 = vtanh.f32 %v552_v23  ;;  %v1094_v26 = vmul.f32 -1.442695, %v552_v23 }
 0x91e   :  { %1358 = vpow2.f32 %v1094_v26 }
 0x926   :  { %v1357_v25 = vpop.eup %1356 }
 0x927   :  { %562 = vrot.lane.b32.xlu0 %v1357_v25, %s1423_s11 }
 0x928   :  { %v1359_v27 = vpop.eup %1358 }
 0x929   :  { %v556_v28 = vadd.f32 1.0, %v1359_v27 }
 0x92b   :  { %1360 = vrcp.f32 %v556_v28 }
 0x935   :  { %v1361_v29 = vpop.eup %1360 }
 0x936   :  { %v560_v32 = vmul.f32 %v1361_v29, %v470_v16  ;;  %v166_v16 = vadd.f32 %v1510_v12, %v1561_v60 }
 0x999   :  { %v563_v30 = vpop.permute.xlu0 %562 }
 0x99a   :  { %v565_v31 = vmul.f32 %v1361_v29, %v563_v30 }
 0x99c   :  { %567 = vrot.lane.b32.xlu1 %v565_v31, %s1424_s3 }
 0xa0e   :  { %v568_v33 = vpop.permute.xlu1 %567 }
 0xa0f   :  { %v570_v34 = vadd.f32 %v568_v33, %v560_v32  ;;  %v171_v32 = vadd.f32 %v1559_v59, %v1510_v12  ;;  %v977_v59 = vld [vmem:[%s1661_s4] sm:$0xff] }
 0xa11   :  { %1362 = vtanh.f32 %v570_v34 }
 0xa1b   :  { %v1363_v35 = vpop.eup %1362 }
 0xa1c   :  { %573 = vrot.lane.b32.xlu0 %v1363_v35, %s1423_s11 }
 0xa8e   :  { %v574_v36 = vpop.permute.xlu0 %573 }
 0xa8f   :  { %v576_v37 = vmul.f32 %v1361_v29, %v574_v36 }
 0xa91   :  { %578 = vrot.lane.b32.xlu1 %v576_v37, %s1424_s3 }
 0xb03   :  { %v579_v38 = vpop.permute.xlu1 %578 }
 0xb04   :  { %1226 = vmatmul.mubr.msk.f32.vlgmr.msra.gmra.mrb[10].mxu0 %vm178_vm3, %v579_v38 }
 0xb05   :  { %1310 = vmatpush3.bf16.msra.mxu0 %v1471_v4  ;;  %1247 = vmatprep.mubr.msk.f32.mxu0 %vm1421_vm2, %v1422_v10 }
 0xb06   :  { %1311 = vmatprep.subr.bf16.mxu0 %v1420_v3 }
 0xb09   :  { %1313 = vmatpush3.bf16.msra.mxu0 %v1488_v9 }
 0xb0a   :  { %1320 = vmatprep.subr.bf16.mxu0 %v1420_v3 }
 0xbd7   :  { %v648_v40 = vpop.f32.mrb[10].mxu0 }
 0xbd8   :  { %v652_v41 = vadd.f32 %v648_v40, %v156_v39  ;;  %v1227_v42 = vpop.f32.mrb[11].mxu0 }
 0xbda   :  { %1364 = vtanh.f32 %v652_v41  ;;  %v1096_v44 = vmul.f32 -1.442695, %v652_v41 }
 0xbdc   :  { %1366 = vpow2.f32 %v1096_v44 }
 0xbe4   :  { %v1365_v43 = vpop.eup %1364 }
 0xbe5   :  { %662 = vrot.lane.b32.xlu0 %v1365_v43, %s1423_s11 }
 0xbe6   :  { %v1367_v45 = vpop.eup %1366 }
 0xbe7   :  { %v656_v46 = vadd.f32 1.0, %v1367_v45  ;;  %v978_v45 = vld [vmem:[%s1661_s4 + $0x8] sm:$0xff] }
 0xbe9   :  { %1368 = vrcp.f32 %v656_v46  ;;  %v979_v46 = vld [vmem:[%s1661_s4 + $0x10] sm:$0xff] }
 0xbf3   :  { %v1369_v47 = vpop.eup %1368 }
 0xbf4   :  { %v660_v50 = vmul.f32 %v1369_v47, %v570_v34 }
 0xc57   :  { %v663_v48 = vpop.permute.xlu0 %662 }
 0xc58   :  { %v665_v49 = vmul.f32 %v1369_v47, %v663_v48  ;;  %v980_v48 = vld [vmem:[%s1661_s4 + $0x18] sm:$0xff]  ;;  %s1425_s4 = smov [#allocation2]  }
 0xc59   :  { %s1070_s1 = sshll.u32 %s1425_s4, 4  ;;  %s1071_s1 = int_to_ptr.vmem [resolvable:$true] %s1070_s1 }
 0xc5a   :  { %667 = vrot.lane.b32.xlu1 %v665_v49, %s1424_s3  ;;  %v1324_v49 = vpack.c.bf16 %v980_v48, %v979_v46  ;;  %s1396_s9 = scalar_lea.vmem %s1071_s1, 128  ;;  %p1401_p1 = scmp.lt.s32.totalorder %s1071_s1, %s1071_s1 }
 0xc5b   :  { %p1397_p0 = scmp.ne.s32.totalorder %s1071_s1, %s1396_s9  ;;  %p1402_p2 = scmp.lt.s32.totalorder %s1396_s9, %s1396_s9 }
 0xc5d   :  { %p1403_p3 = por %p1402_p2, %p1401_p1 }
 0xc5f   :  { %p1404_p4 = pnand %p1403_p3, %p1397_p0 }
 0xccc   :  { %v668_v51 = vpop.permute.xlu1 %667 }
 0xccd   :  { %v670_v52 = vadd.f32 %v668_v51, %v660_v50 }
 0xccf   :  { %1370 = vtanh.f32 %v670_v52 }
 0xcd9   :  { %v1371_v53 = vpop.eup %1370 }
 0xcda   :  { %673 = vrot.lane.b32.xlu0 %v1371_v53, %s1423_s11 }
 0xd4c   :  { %v674_v54 = vpop.permute.xlu0 %673 }
 0xd4d   :  { %v676_v55 = vmul.f32 %v1369_v47, %v674_v54  ;;  %v1321_v47 = vpack.c.bf16 %v978_v45, %v977_v59  ;;  %v1103_v54 = vld [vmem:[%s1662_s5] ss:$0 sm:$0xff] }
 0xd4f   :  { %678 = vrot.lane.b32.xlu1 %v676_v55, %s1424_s3 }
 0xdc1   :  { %v679_v56 = vpop.permute.xlu1 %678 }
 0xdc2   :  { %1237 = vmatmul.mubr.msk.f32.vlgmr.msra.gmra.mrb[6].mxu1 %vm178_vm3, %v679_v56 }
 0xdc3   :  { %1316 = vmatpush3.bf16.msra.mxu1 %v1471_v4  ;;  %1258 = vmatprep.mubr.msk.f32.mxu1 %vm1421_vm2, %v1422_v10 }
 0xdc4   :  { %1317 = vmatprep.subr.bf16.mxu1 %v1420_v3 }
 0xdc7   :  { %1319 = vmatpush3.bf16.msra.mxu1 %v1488_v9 }
 0xe95   :  { %v748_v61 = vpop.f32.mrb[6].mxu1 }
 0xe96   :  { %v752_v62 = vadd.f32 %v748_v61, %v161_v58  ;;  %v1238_v63 = vpop.f32.mrb[7].mxu1 }
 0xe98   :  { %1372 = vtanh.f32 %v752_v62  ;;  %v1098_v1 = vmul.f32 -1.442695, %v752_v62 }
 0xe9a   :  { %1374 = vpow2.f32 %v1098_v1 }
 0xea2   :  { %v1373_v0 = vpop.eup %1372 }
 0xea3   :  { %762 = vrot.lane.b32.xlu0 %v1373_v0, %s1423_s11 }
 0xea4   :  { %v1375_v4 = vpop.eup %1374 }
 0xea5   :  { %v756_v2 = vadd.f32 1.0, %v1375_v4 }
 0xea7   :  { %1376 = vrcp.f32 %v756_v2 }
 0xeb1   :  { %v1377_v5 = vpop.eup %1376 }
 0xeb2   :  { %v760_v9 = vmul.f32 %v1377_v5, %v670_v52 }
 0xf15   :  { %v763_v6 = vpop.permute.xlu0 %762 }
 0xf16   :  { %v765_v7 = vmul.f32 %v1377_v5, %v763_v6 }
 0xf18   :  { %767 = vrot.lane.b32.xlu1 %v765_v7, %s1424_s3 }
 0xf8a   :  { %v768_v8 = vpop.permute.xlu1 %767 }
 0xf8b   :  { %v770_v57 = vadd.f32 %v768_v8, %v760_v9 }
 0xf8d   :  { %1378 = vtanh.f32 %v770_v57 }
 0xf97   :  { %v1379_v11 = vpop.eup %1378 }
 0xf98   :  { %773 = vrot.lane.b32.xlu0 %v1379_v11, %s1423_s11 }
0x100a   :  { %v774_v13 = vpop.permute.xlu0 %773 }
0x100b   :  { %v776_v14 = vmul.f32 %v1377_v5, %v774_v13 }
0x100d   :  { %778 = vrot.lane.b32.xlu1 %v776_v14, %s1424_s3 }
0x107f   :  { %v779_v15 = vpop.permute.xlu1 %778 }
0x1080   :  { %1248 = vmatmul.mubr.msk.f32.vlgmr.msra.gmra.mrb[12].mxu0 %vm178_vm3, %v779_v15 }
0x1081   :  { %1269 = vmatprep.mubr.msk.f32.mxu0 %vm1421_vm2, %v1422_v10  ;;  %1322 = vmatpush3.bf16.msra.mxu0 %v1321_v47 }
0x1082   :  { %1323 = vmatprep.subr.bf16.mxu0 %v1420_v3 }
0x1085   :  { %1325 = vmatpush3.bf16.msra.mxu0 %v1324_v49 }
0x1153   :  { %v848_v17 = vpop.f32.mrb[12].mxu0 }
0x1154   :  { %v852_v18 = vadd.f32 %v848_v17, %v166_v16  ;;  %v1249_v19 = vpop.f32.mrb[13].mxu0 }
0x1156   :  { %1380 = vtanh.f32 %v852_v18  ;;  %v1100_v21 = vmul.f32 -1.442695, %v852_v18 }
0x1158   :  { %1382 = vpow2.f32 %v1100_v21 }
0x1160   :  { %v1381_v20 = vpop.eup %1380 }
0x1161   :  { %862 = vrot.lane.b32.xlu0 %v1381_v20, %s1423_s11 }
0x1162   :  { %v1383_v22 = vpop.eup %1382 }
0x1163   :  { %v856_v23 = vadd.f32 1.0, %v1383_v22 }
0x1165   :  { %1384 = vrcp.f32 %v856_v23 }
0x116f   :  { %v1385_v24 = vpop.eup %1384 }
0x1170   :  { %v860_v10 = vmul.f32 %v1385_v24, %v770_v57 }
0x11d3   :  { %v863_v25 = vpop.permute.xlu0 %862 }
0x11d4   :  { %v865_v26 = vmul.f32 %v1385_v24, %v863_v25 }
0x11d6   :  { %867 = vrot.lane.b32.xlu1 %v865_v26, %s1424_s3 }
0x1248   :  { %v868_v27 = vpop.permute.xlu1 %867 }
0x1249   :  { %v870_v60 = vadd.f32 %v868_v27, %v860_v10 }
0x124b   :  { %1386 = vtanh.f32 %v870_v60 }
0x1255   :  { %v1387_v28 = vpop.eup %1386 }
0x1256   :  { %873 = vrot.lane.b32.xlu0 %v1387_v28, %s1423_s11 }
0x12c8   :  { %v874_v29 = vpop.permute.xlu0 %873 }
0x12c9   :  { %v876_v30 = vmul.f32 %v1385_v24, %v874_v29 }
0x12cb   :  { %878 = vrot.lane.b32.xlu1 %v876_v30, %s1424_s3 }
0x133d   :  { %v879_v31 = vpop.permute.xlu1 %878 }
0x133e   :  { %1259 = vmatmul.mubr.msk.f32.vlgmr.msra.gmra.mrb[8].mxu1 %vm178_vm3, %v879_v31 }
0x1411   :  { %v948_v33 = vpop.f32.mrb[8].mxu1 }
0x1412   :  { %v952_v34 = vadd.f32 %v948_v33, %v171_v32  ;;  %v1260_v35 = vpop.f32.mrb[9].mxu1 }
0x1414   :  { %1388 = vtanh.f32 %v952_v34  ;;  %v1102_v37 = vmul.f32 -1.442695, %v952_v34 }
0x1416   :  { %1390 = vpow2.f32 %v1102_v37 }
0x141e   :  { %v1389_v36 = vpop.eup %1388 }
0x141f   :  { %962 = vrot.lane.b32.xlu0 %v1389_v36, %s1423_s11 }
0x1420   :  { %v1391_v38 = vpop.eup %1390 }
0x1421   :  { %v956_v39 = vadd.f32 1.0, %v1391_v38 }
0x1423   :  { %1392 = vrcp.f32 %v956_v39 }
0x142d   :  { %v1393_v40 = vpop.eup %1392 }
0x142e   :  { %v960_v43 = vmul.f32 %v1393_v40, %v870_v60 }
0x1491   :  { %v963_v41 = vpop.permute.xlu0 %962 }
0x1492   :  { %v965_v42 = vmul.f32 %v1393_v40, %v963_v41 }
0x1494   :  { %967 = vrot.lane.b32.xlu1 %v965_v42, %s1424_s3 }
0x1506   :  { %v968_v44 = vpop.permute.xlu1 %967 }
0x1507   :  { %v970_v12 = vadd.f32 %v968_v44, %v960_v43 }
0x1509   :  { %1394 = vtanh.f32 %v970_v12 }
0x1513   :  { %v1395_v50 = vpop.eup %1394 }
0x1514   :  { %973 = vrot.lane.b32.xlu0 %v1395_v50, %s1423_s11 }
0x1586   :  { %v974_v51 = vpop.permute.xlu0 %973 }
0x1587   :  { %v976_v52 = vmul.f32 %v1393_v40, %v974_v51 }
0x1589   :  { %989 = vrot.lane.b32.xlu1 %v976_v52, %s1424_s3 }
0x15fb   :  { %v990_v53 = vpop.permute.xlu1 %989 }
0x15fc   :  { %1270 = vmatmul.mubr.msk.f32.vlgmr.msra.gmra.mrb[14].mxu0 %vm178_vm3, %v990_v53 }
0x16cf   :  { %v1059_v55 = vpop.f32.mrb[14].mxu0 }
0x16d0   :  { %v1060_v56 = vadd.f32 %v1103_v54, %v1059_v55  ;;  %v1271_v3 = vpop.f32.mrb[15].mxu0 }
0x16d2   :  { %1063 = vst [vmem:[#allocation2] sm:$0xff] %v1060_v56 }
0x16d3   :  { %1407 = shalt.err (!%p1404_p4)
}
0x16d4   :  { %s1408_s11 = scalar_lea.hbm %s1663_s6, 128 }
0x16d5   :  { %p1409_p5 = scmp.ne.s32.totalorder %s1663_s6, %s1408_s11  ;;  %p1412_p6 = scmp.lt.u32.totalorder %s1408_s11, %s1663_s6 }
0x16d7   :  { %p1414_p7 = pnand %p1412_p6, %p1409_p5 }
0x16d9   :  { %1417 = shalt.err (!%p1414_p7)
}
0x16da   :  { %1073 = dma.vmem_to_hbm [thread:$0]  %s1071_s1, 128, %s1663_s6, [#allocation3]  }
0x16db   :  { %1418 = dma.done.wait [#allocation3], 128  }
0x16dc   :  { %1419 = vsyncadd [#allocation3], 4294967168 }
0x16dd   :  { %1077 = vsyncpa [#allocation3], 1 }

</bundles_post_ra>
